<compile_context>
chip_gen: v7x
topology: tpu7x:2x2x1
jax: 0.10.0
libtpu: 0.0.40
codegen_flags: <defaults>
</compile_context>

<pallas_src>
import jax
import jax.numpy as jnp
from jax.experimental import pallas as pl
from jax.experimental.pallas import tpu as pltpu

NEG_SLOPE = 0.01   # nn.LeakyReLU default negative_slope
BN_EPS = 1e-5      # nn.BatchNorm1d default eps
LANE = 128
NEG_BIG = -1e30    # bias for padded softmax lanes -> exp() == 0


def _round_up(x, m):
    return (x + m - 1) // m * m


# ----------------------------------------------------------------------------
# Kernel: per batch-tile, 4 matmuls + bias + LeakyReLU + softmax.
# ----------------------------------------------------------------------------
def clusterer_kernel(x_ref, w1_ref, b1_ref, w2_ref, b2_ref,
                     w3_ref, b3_ref, w4_ref, b4_ref, out_ref):
    # x arrives in its native dtype; cast to bf16 in-kernel for the MXU.
    x = x_ref[...].astype(jnp.bfloat16)                 # (tile_b, nx)

    # Linear(nx, nh) with eval-mode BatchNorm1d folded into w1/b1.
    # Dropout(p=0.25) is identity in eval mode.
    h = jnp.dot(x, w1_ref[...], preferred_element_type=jnp.float32) + b1_ref[...]

    # Linear(nh, nh) with second BatchNorm1d folded into w2/b2.
    h = jnp.dot(h.astype(w2_ref.dtype), w2_ref[...],
                preferred_element_type=jnp.float32) + b2_ref[...]

    # LeakyReLU
    h = jnp.where(h >= 0.0, h, NEG_SLOPE * h)

    # Linear(nh, nclasses_pad) + Softmax(dim=-1).  Padded lanes carry NEG_BIG
    # in b3 (f32) so their exp() is exactly 0 and the denominator is unaffected.
    logits = jnp.dot(h.astype(w3_ref.dtype), w3_ref[...],
                     preferred_element_type=jnp.float32) + b3_ref[...]
    m = jnp.max(logits, axis=-1, keepdims=True)
    e = jnp.exp(logits - m)
    inv = pl.reciprocal(jnp.sum(e, axis=-1, keepdims=True), approx=True)
    y = e * inv

    # clusterhead_embedding: Linear(nclasses_pad, nz_pad)
    c = jnp.dot(y.astype(w4_ref.dtype), w4_ref[...],
                preferred_element_type=jnp.float32) + b4_ref[...]
    out_ref[...] = c.astype(out_ref.dtype)              # bf16, lane-dense store


# ----------------------------------------------------------------------------
# Parameter construction (PyTorch-style init) and host-side fusion/padding.
# ----------------------------------------------------------------------------
def make_raw_params(key, nx, nh, nclasses, nz):
    """Raw f32 parameters mirroring the PyTorch module (uniform +-1/sqrt(fan_in))."""
    ks = jax.random.split(key, 8)

    def lin(kw, kb, fan_in, fan_out):
        bound = 1.0 / jnp.sqrt(jnp.float32(fan_in))
        w = jax.random.uniform(kw, (fan_in, fan_out), jnp.float32, -bound, bound)
        b = jax.random.uniform(kb, (fan_out,), jnp.float32, -bound, bound)
        return w, b

    w1, b1 = lin(ks[0], ks[1], nx, nh)
    w2, b2 = lin(ks[2], ks[3], nh, nh)
    w3, b3 = lin(ks[4], ks[5], nh, nclasses)
    w4, b4 = lin(ks[6], ks[7], nclasses, nz)

    # BatchNorm1d default init / running stats (eval mode).
    bn = dict(gamma=jnp.ones((nh,), jnp.float32), beta=jnp.zeros((nh,), jnp.float32),
              mean=jnp.zeros((nh,), jnp.float32), var=jnp.ones((nh,), jnp.float32))

    return dict(w1=w1, b1=b1, bn1=dict(bn), w2=w2, b2=b2, bn2=dict(bn),
                w3=w3, b3=b3, w4=w4, b4=b4,
                nx=nx, nh=nh, nclasses=nclasses, nz=nz)


def fuse_params(raw):
    """Fold BN into the preceding Linear, lane-pad the narrow layers, cast
    weights to bf16 (biases stay f32)."""
    nclasses, nz = raw["nclasses"], raw["nz"]
    nc_pad = _round_up(nclasses, LANE)
    nz_pad = _round_up(nz, LANE)

    def bn_scale_shift(bn):
        s = bn["gamma"] / jnp.sqrt(bn["var"] + BN_EPS)
        t = bn["beta"] - bn["mean"] * s
        return s, t

    s1, t1 = bn_scale_shift(raw["bn1"])
    s2, t2 = bn_scale_shift(raw["bn2"])

    w1f = (raw["w1"] * s1[None, :]).astype(jnp.bfloat16)
    b1f = (raw["b1"] * s1 + t1)[None, :].astype(jnp.float32)
    w2f = (raw["w2"] * s2[None, :]).astype(jnp.bfloat16)
    b2f = (raw["b2"] * s2 + t2)[None, :].astype(jnp.float32)

    # Pad classifier to 128 lanes; padded logits get NEG_BIG bias (kept f32).
    w3p = jnp.zeros((raw["nh"], nc_pad), jnp.float32).at[:, :nclasses].set(raw["w3"])
    b3p = jnp.full((1, nc_pad), NEG_BIG, jnp.float32).at[0, :nclasses].set(raw["b3"])

    # Pad clusterhead embedding to 128x128.
    w4p = jnp.zeros((nc_pad, nz_pad), jnp.float32).at[:nclasses, :nz].set(raw["w4"])
    b4p = jnp.zeros((1, nz_pad), jnp.float32).at[0, :nz].set(raw["b4"])

    return dict(w1=w1f, b1=b1f, w2=w2f, b2=b2f,
                w3=w3p.astype(jnp.bfloat16), b3=b3p,
                w4=w4p.astype(jnp.bfloat16), b4=b4p,
                nx=raw["nx"], nh=raw["nh"], nclasses=nclasses, nz=nz,
                nc_pad=nc_pad, nz_pad=nz_pad)


# ----------------------------------------------------------------------------
# Batch-tile selection: amortize per-grid-step overhead at large B, avoid
# wasted work at tiny B, and stay under the v5e 16 MiB scoped-VMEM default.
# ----------------------------------------------------------------------------
def _pick_tile_b(B, nx, x_itemsize):
    if B <= 16:
        return 16                               # bf16 sublane-pack friendly minimum
    budget = 8 * 1024 * 1024                    # x double-buffer budget (bytes)
    max_tb = max(16, budget // (2 * nx * x_itemsize))
    tb = min(1024, max_tb, _round_up(B, 16))
    return max(16, (tb // 16) * 16)


# ----------------------------------------------------------------------------
# Wrapper
# ----------------------------------------------------------------------------
def clusterer_forward(x, fused, tile_b=None):
    B = x.shape[0]
    nx, nz, nz_pad = fused["nx"], fused["nz"], fused["nz_pad"]

    # Flatten is a free metadata reshape; keep x in its native dtype (no extra
    # HBM pass for a host-side bf16 cast — the kernel casts on the VPU).
    x_flat = x.reshape(B, -1)
    assert x_flat.shape[1] == nx
    if x_flat.dtype not in (jnp.float32, jnp.bfloat16):
        x_flat = x_flat.astype(jnp.float32)

    if tile_b is None:
        tile_b = _pick_tile_b(B, nx, x_flat.dtype.itemsize)

    # No jnp.pad: non-divisible batches are handled by boundary-block masking.
    num_tiles = pl.cdiv(B, tile_b)

    const = lambda i: (0, 0)
    in_specs = [
        pl.BlockSpec((tile_b, nx), lambda i: (i, 0)),          # x tile (pipelined)
        pl.BlockSpec(fused["w1"].shape, const),                # weights: VMEM-resident
        pl.BlockSpec(fused["b1"].shape, const),
        pl.BlockSpec(fused["w2"].shape, const),
        pl.BlockSpec(fused["b2"].shape, const),
        pl.BlockSpec(fused["w3"].shape, const),
        pl.BlockSpec(fused["b3"].shape, const),
        pl.BlockSpec(fused["w4"].shape, const),
        pl.BlockSpec(fused["b4"].shape, const),
    ]
    out_spec = pl.BlockSpec((tile_b, nz_pad), lambda i: (i, 0))

    out = pl.pallas_call(
        clusterer_kernel,
        out_shape=jax.ShapeDtypeStruct((B, nz_pad), jnp.bfloat16),  # bf16 store: half traffic
        grid=(num_tiles,),
        in_specs=in_specs,
        out_specs=out_spec,
        compiler_params=pltpu.CompilerParams(
            dimension_semantics=("parallel",)),
    )(x_flat, fused["w1"], fused["b1"], fused["w2"], fused["b2"],
      fused["w3"], fused["b3"], fused["w4"], fused["b4"])

    # Slice off lane padding; cast the small (B, nz) result back to f32.
    return out[:, :nz].astype(jnp.float32)


# ----------------------------------------------------------------------------
# Pure-JAX f32 reference mirroring the PyTorch module (eval mode).
# ----------------------------------------------------------------------------
def clusterer_reference(x, raw):
    B = x.shape[0]
    h = x.reshape(B, -1).astype(jnp.float32)

    def bn(h, p):
        s = p["gamma"] / jnp.sqrt(p["var"] + BN_EPS)
        return (h - p["mean"]) * s + p["beta"]

    h = h @ raw["w1"] + raw["b1"]
    h = bn(h, raw["bn1"])                      # dropout == identity (eval)
    h = h @ raw["w2"] + raw["b2"]
    h = bn(h, raw["bn2"])
    h = jnp.where(h >= 0.0, h, NEG_SLOPE * h)
    logits = h @ raw["w3"] + raw["b3"]
    y = jax.nn.softmax(logits, axis=-1)
    return y @ raw["w4"] + raw["b4"]


if __name__ == "__main__":
    # Small shapes consistent with the module: B=2, C=4, H=W=16 -> nx=1024,
    # nh=128, nclasses=10, nz=10.
    B, C, H, W = 2, 4, 16, 16
    nx = C * H * W
    nh, nclasses, nz = 128, 10, 10

    key = jax.random.PRNGKey(0)
    kx, kp = jax.random.split(key)
    x = jax.random.normal(kx, (B, C, H, W), jnp.float32)

    raw = make_raw_params(kp, nx, nh, nclasses, nz)
    fused = fuse_params(raw)

    out = clusterer_forward(x, fused)
    out = jax.block_until_ready(out)

    ref = clusterer_reference(x, raw)
    assert out.shape == (B, nz)
    # bf16 MXU operands + bf16 output store -> loosened tolerance vs f32 reference.
    assert jnp.allclose(out, ref, atol=3e-2, rtol=3e-2), "mismatch vs reference"

    print("KERNEL_OK")
</pallas_src>

<mosaic_0001>
module attributes {stable_mosaic.version = 11 : i64} {
  func.func @clusterer_kernel(%arg0: i32, %arg1: memref<16x1024xf32, #tpu.memory_space<vmem>>, %arg2: memref<1024x128xbf16, #tpu.memory_space<vmem>>, %arg3: memref<1x128xf32, #tpu.memory_space<vmem>>, %arg4: memref<128x128xbf16, #tpu.memory_space<vmem>>, %arg5: memref<1x128xf32, #tpu.memory_space<vmem>>, %arg6: memref<128x128xbf16, #tpu.memory_space<vmem>>, %arg7: memref<1x128xf32, #tpu.memory_space<vmem>>, %arg8: memref<128x128xbf16, #tpu.memory_space<vmem>>, %arg9: memref<1x128xf32, #tpu.memory_space<vmem>>, %arg10: memref<16x128xbf16, #tpu.memory_space<vmem>>) attributes {dimension_semantics = [#tpu.dimension_semantics<parallel>], iteration_bounds = array<i64: 1>, scalar_prefetch = 0 : i64, scratch_operands = 0 : i64, tpu.core_type = #tpu.core_type<tc>, window_params = [{transform_indices = @transform_0, window_bounds = array<i64: 16, 1024>}, {pipeline_mode = #tpu.pipeline_mode<synchronous>, transform_indices = @transform_1, window_bounds = array<i64: 1024, 128>}, {pipeline_mode = #tpu.pipeline_mode<synchronous>, transform_indices = @transform_2, window_bounds = array<i64: 1, 128>}, {pipeline_mode = #tpu.pipeline_mode<synchronous>, transform_indices = @transform_3, window_bounds = array<i64: 128, 128>}, {pipeline_mode = #tpu.pipeline_mode<synchronous>, transform_indices = @transform_4, window_bounds = array<i64: 1, 128>}, {pipeline_mode = #tpu.pipeline_mode<synchronous>, transform_indices = @transform_5, window_bounds = array<i64: 128, 128>}, {pipeline_mode = #tpu.pipeline_mode<synchronous>, transform_indices = @transform_6, window_bounds = array<i64: 1, 128>}, {pipeline_mode = #tpu.pipeline_mode<synchronous>, transform_indices = @transform_7, window_bounds = array<i64: 128, 128>}, {pipeline_mode = #tpu.pipeline_mode<synchronous>, transform_indices = @transform_8, window_bounds = array<i64: 1, 128>}, {transform_indices = @transform_9, window_bounds = array<i64: 16, 128>}]} {
    %c0 = arith.constant 0 : index
    %c0_0 = arith.constant 0 : index
    %0 = vector.load %arg1[%c0, %c0_0] : memref<16x1024xf32, #tpu.memory_space<vmem>>, vector<16x1024xf32>
    %1 = arith.truncf %0 : vector<16x1024xf32> to vector<16x1024xbf16>
    %c0_1 = arith.constant 0 : index
    %c0_2 = arith.constant 0 : index
    %2 = vector.load %arg2[%c0_1, %c0_2] : memref<1024x128xbf16, #tpu.memory_space<vmem>>, vector<1024x128xbf16>
    %cst = arith.constant dense<0.000000e+00> : vector<16x128xf32>
    %3 = tpu.matmul %1, %2, %cst {dimension_numbers = #tpu.dot_dimension_numbers<[1], [0], [0], [1], [0, 0, 1, 1], [], []>} : vector<16x1024xbf16>, vector<1024x128xbf16>, vector<16x128xf32> -> vector<16x128xf32>
    %c0_3 = arith.constant 0 : index
    %c0_4 = arith.constant 0 : index
    %4 = vector.load %arg3[%c0_3, %c0_4] : memref<1x128xf32, #tpu.memory_space<vmem>>, vector<1x128xf32>
    %5 = vector.broadcast %4 : vector<1x128xf32> to vector<16x128xf32>
    %6 = arith.addf %3, %5 : vector<16x128xf32>
    %7 = arith.truncf %6 : vector<16x128xf32> to vector<16x128xbf16>
    %c0_5 = arith.constant 0 : index
    %c0_6 = arith.constant 0 : index
    %8 = vector.load %arg4[%c0_5, %c0_6] : memref<128x128xbf16, #tpu.memory_space<vmem>>, vector<128x128xbf16>
    %cst_7 = arith.constant dense<0.000000e+00> : vector<16x128xf32>
    %9 = tpu.matmul %7, %8, %cst_7 {dimension_numbers = #tpu.dot_dimension_numbers<[1], [0], [0], [1], [0, 0, 1, 1], [], []>} : vector<16x128xbf16>, vector<128x128xbf16>, vector<16x128xf32> -> vector<16x128xf32>
    %c0_8 = arith.constant 0 : index
    %c0_9 = arith.constant 0 : index
    %10 = vector.load %arg5[%c0_8, %c0_9] : memref<1x128xf32, #tpu.memory_space<vmem>>, vector<1x128xf32>
    %11 = vector.broadcast %10 : vector<1x128xf32> to vector<16x128xf32>
    %12 = arith.addf %9, %11 : vector<16x128xf32>
    %cst_10 = arith.constant 0.000000e+00 : f32
    %13 = vector.broadcast %cst_10 : f32 to vector<16x128xf32>
    %14 = arith.cmpf oge, %12, %13 : vector<16x128xf32>
    %cst_11 = arith.constant 0.00999999977 : f32
    %15 = vector.broadcast %cst_11 : f32 to vector<16x128xf32>
    %16 = arith.mulf %15, %12 : vector<16x128xf32>
    %17 = arith.select %14, %12, %16 : vector<16x128xi1>, vector<16x128xf32>
    %18 = arith.truncf %17 : vector<16x128xf32> to vector<16x128xbf16>
    %c0_12 = arith.constant 0 : index
    %c0_13 = arith.constant 0 : index
    %19 = vector.load %arg6[%c0_12, %c0_13] : memref<128x128xbf16, #tpu.memory_space<vmem>>, vector<128x128xbf16>
    %cst_14 = arith.constant dense<0.000000e+00> : vector<16x128xf32>
    %20 = tpu.matmul %18, %19, %cst_14 {dimension_numbers = #tpu.dot_dimension_numbers<[1], [0], [0], [1], [0, 0, 1, 1], [], []>} : vector<16x128xbf16>, vector<128x128xbf16>, vector<16x128xf32> -> vector<16x128xf32>
    %c0_15 = arith.constant 0 : index
    %c0_16 = arith.constant 0 : index
    %21 = vector.load %arg7[%c0_15, %c0_16] : memref<1x128xf32, #tpu.memory_space<vmem>>, vector<1x128xf32>
    %22 = vector.broadcast %21 : vector<1x128xf32> to vector<16x128xf32>
    %23 = arith.addf %20, %22 : vector<16x128xf32>
    %cst_17 = arith.constant dense<0xFF800000> : vector<16xf32>
    %24 = vector.multi_reduction <maximumf>, %23, %cst_17 [1] : vector<16x128xf32> to vector<16xf32>
    %25 = vector.shape_cast %24 : vector<16xf32> to vector<16x1xf32>
    %26 = vector.broadcast %25 : vector<16x1xf32> to vector<16x128xf32>
    %27 = arith.subf %23, %26 : vector<16x128xf32>
    %28 = math.exp %27 : vector<16x128xf32>
    %cst_18 = arith.constant dense<0.000000e+00> : vector<16xf32>
    %29 = vector.multi_reduction <add>, %28, %cst_18 [1] : vector<16x128xf32> to vector<16xf32>
    %30 = vector.shape_cast %29 : vector<16xf32> to vector<16x1xf32>
    %31 = tpu.reciprocal %30 {approx = true} : vector<16x1xf32> -> vector<16x1xf32>
    %32 = vector.broadcast %31 : vector<16x1xf32> to vector<16x128xf32>
    %33 = arith.mulf %28, %32 : vector<16x128xf32>
    %34 = arith.truncf %33 : vector<16x128xf32> to vector<16x128xbf16>
    %c0_19 = arith.constant 0 : index
    %c0_20 = arith.constant 0 : index
    %35 = vector.load %arg8[%c0_19, %c0_20] : memref<128x128xbf16, #tpu.memory_space<vmem>>, vector<128x128xbf16>
    %cst_21 = arith.constant dense<0.000000e+00> : vector<16x128xf32>
    %36 = tpu.matmul %34, %35, %cst_21 {dimension_numbers = #tpu.dot_dimension_numbers<[1], [0], [0], [1], [0, 0, 1, 1], [], []>} : vector<16x128xbf16>, vector<128x128xbf16>, vector<16x128xf32> -> vector<16x128xf32>
    %c0_22 = arith.constant 0 : index
    %c0_23 = arith.constant 0 : index
    %37 = vector.load %arg9[%c0_22, %c0_23] : memref<1x128xf32, #tpu.memory_space<vmem>>, vector<1x128xf32>
    %38 = vector.broadcast %37 : vector<1x128xf32> to vector<16x128xf32>
    %39 = arith.addf %36, %38 : vector<16x128xf32>
    %40 = arith.truncf %39 : vector<16x128xf32> to vector<16x128xbf16>
    %c0_24 = arith.constant 0 : index
    %c0_25 = arith.constant 0 : index
    %41 = vector.load %arg10[%c0_24, %c0_25] : memref<16x128xbf16, #tpu.memory_space<vmem>>, vector<16x128xbf16>
    tpu.vector_store %arg10[%c0_24, %c0_25], %40 {strides = array<i32>} : memref<16x128xbf16, #tpu.memory_space<vmem>>, vector<16x128xbf16>,
    return
  }
  func.func @transform_0(%arg0: i32) -> (i32, i32) {
    %c0_i32 = arith.constant 0 : i32
    %c0_i32_0 = arith.constant 0 : i32
    return %arg0, %c0_i32 : i32, i32
  }
  func.func @transform_1(%arg0: i32) -> (i32, i32) {
    %c0_i32 = arith.constant 0 : i32
    %c0_i32_0 = arith.constant 0 : i32
    %c0_i32_1 = arith.constant 0 : i32
    return %c0_i32, %c0_i32_0 : i32, i32
  }
  func.func @transform_2(%arg0: i32) -> (i32, i32) {
    %c0_i32 = arith.constant 0 : i32
    %c0_i32_0 = arith.constant 0 : i32
    %c0_i32_1 = arith.constant 0 : i32
    return %c0_i32, %c0_i32_0 : i32, i32
  }
  func.func @transform_3(%arg0: i32) -> (i32, i32) {
    %c0_i32 = arith.constant 0 : i32
    %c0_i32_0 = arith.constant 0 : i32
    %c0_i32_1 = arith.constant 0 : i32
    return %c0_i32, %c0_i32_0 : i32, i32
  }
  func.func @transform_4(%arg0: i32) -> (i32, i32) {
    %c0_i32 = arith.constant 0 : i32
    %c0_i32_0 = arith.constant 0 : i32
    %c0_i32_1 = arith.constant 0 : i32
    return %c0_i32, %c0_i32_0 : i32, i32
  }
  func.func @transform_5(%arg0: i32) -> (i32, i32) {
    %c0_i32 = arith.constant 0 : i32
    %c0_i32_0 = arith.constant 0 : i32
    %c0_i32_1 = arith.constant 0 : i32
    return %c0_i32, %c0_i32_0 : i32, i32
  }
  func.func @transform_6(%arg0: i32) -> (i32, i32) {
    %c0_i32 = arith.constant 0 : i32
    %c0_i32_0 = arith.constant 0 : i32
    %c0_i32_1 = arith.constant 0 : i32
    return %c0_i32, %c0_i32_0 : i32, i32
  }
  func.func @transform_7(%arg0: i32) -> (i32, i32) {
    %c0_i32 = arith.constant 0 : i32
    %c0_i32_0 = arith.constant 0 : i32
    %c0_i32_1 = arith.constant 0 : i32
    return %c0_i32, %c0_i32_0 : i32, i32
  }
  func.func @transform_8(%arg0: i32) -> (i32, i32) {
    %c0_i32 = arith.constant 0 : i32
    %c0_i32_0 = arith.constant 0 : i32
    %c0_i32_1 = arith.constant 0 : i32
    return %c0_i32, %c0_i32_0 : i32, i32
  }
  func.func @transform_9(%arg0: i32) -> (i32, i32) {
    %c0_i32 = arith.constant 0 : i32
    %c0_i32_0 = arith.constant 0 : i32
    return %arg0, %c0_i32 : i32, i32
  }
}

</mosaic_0001>

<bundles_post_ra>
// kernel: tpu_custom_call.1
= control target key start
LH: loop header
LB: loop body
LE: loop exit
PB: predicated region body
PF: predicated region fallthrough
CT: control target
= control target key end

     0   :  { %14 = vsyncpa [#allocation3], 0  ;;  %s2197_s0 = inlined_call_operand.hbm [shape: f32[2,1024], index: 0, kind: input, shape index: {}]   ;;  %s2198_s1 = inlined_call_operand.hbm [shape: bf16[1024,128], index: 1, kind: input, shape index: {}]   ;;  %s2199_s2 = inlined_call_operand.vmem [shape: f32[1,128], index: 2, kind: input, shape index: {}]   ;;  %s2200_s3 = inlined_call_operand.hbm [shape: bf16[128,128], index: 3, kind: input, shape index: {}]   ;;  %s2201_s4 = inlined_call_operand.vmem [shape: f32[1,128], index: 4, kind: input, shape index: {}]   ;;  %s2202_s5 = inlined_call_operand.hbm [shape: bf16[128,128], index: 5, kind: input, shape index: {}]   ;;  %s2203_s6 = inlined_call_operand.vmem [shape: f32[1,128], index: 6, kind: input, shape index: {}]   ;;  %s2204_s7 = inlined_call_operand.hbm [shape: bf16[128,128], index: 7, kind: input, shape index: {}]   ;;  %s2205_s8 = inlined_call_operand.vmem [shape: f32[1,128], index: 8, kind: input, shape index: {}]   ;;  %s2206_s9 = inlined_call_operand.hbm [shape: bf16[2,128], index: 9, kind: output, shape index: {}]  }
   0x1   :  { %15 = vsyncpa [#allocation6], 0 }
   0x2   :  { %16 = vsyncpa [#allocation9], 0 }
   0x3   :  { %17 = vsyncpa [#allocation4], 0 }
   0x4   :  { %22 = vsyncadd [#allocation3], 1792  ;;  %s1981_s30 = smov [#allocation5]   ;;  %s1841_s13 = scalar_lea.hbm %s2198_s1, 8192 }
   0x5   :  { %s35_s10 = sshll.u32 %s1981_s30, 4  ;;  %p1842_p0 = scmp.ne.s32.totalorder %s2198_s1, %s1841_s13  ;;  %s36_s10 = int_to_ptr.vmem [resolvable:$true] %s35_s10 }
   0x6   :  { %p1845_p1 = scmp.lt.u32.totalorder %s1841_s13, %s2198_s1 }
   0x8   :  { %p1847_p2 = pnand %p1845_p1, %p1842_p0 }
   0xa   :  { %1850 = shalt.err (!%p1847_p2)
}
   0xb   :  { %s1851_s18 = scalar_lea.vmem %s36_s10, 8192  ;;  %p1856_p4 = scmp.lt.s32.totalorder %s36_s10, %s36_s10 }
   0xc   :  { %p1852_p3 = scmp.ne.s32.totalorder %s36_s10, %s1851_s18  ;;  %p1857_p5 = scmp.lt.s32.totalorder %s1851_s18, %s1851_s18 }
   0xe   :  { %p1858_p6 = por %p1857_p5, %p1856_p4 }
  0x10   :  { %p1859_p7 = pnand %p1858_p6, %p1852_p3 }
  0x12   :  { %1862 = shalt.err (!%p1859_p7)
}
  0x13   :  { %s1982_s19 = smov 64   ;;  %s1983_s20 = smov 4  }
  0x14   :  { %41 = dma.hbm_to_vmem [thread:$0]  %s2198_s1, 8192, %s36_s10, [#allocation6], %s1982_s19, %s1982_s19, %s1983_s20  }
  0x15   :  { %s1984_s23 = smov [#allocation8]   ;;  %s1985_s25 = smov [#allocation2]  }
  0x16   :  { %s63_s24 = sshll.u32 %s1984_s23, 4  ;;  %s23_s26 = sshll.u32 %s1985_s25, 4  ;;  %s64_s24 = int_to_ptr.vmem [resolvable:$true] %s63_s24  ;;  %s24_s26 = int_to_ptr.vmem [resolvable:$true] %s23_s26 }
  0x17   :  { %s1863_s29 = scalar_lea.hbm %s2202_s5, 1024 }
  0x18   :  { %p1864_p8 = scmp.ne.s32.totalorder %s2202_s5, %s1863_s29  ;;  %p1867_p9 = scmp.lt.u32.totalorder %s1863_s29, %s2202_s5 }
  0x1a   :  { %p1869_p10 = pnand %p1867_p9, %p1864_p8 }
  0x1c   :  { %1872 = shalt.err (!%p1869_p10)
}
  0x1d   :  { %s1873_s1 = scalar_lea.vmem %s64_s24, 1024  ;;  %p1878_p12 = scmp.lt.s32.totalorder %s64_s24, %s64_s24 }
  0x1e   :  { %p1874_p11 = scmp.ne.s32.totalorder %s64_s24, %s1873_s1  ;;  %p1879_p13 = scmp.lt.s32.totalorder %s1873_s1, %s1873_s1 }
  0x20   :  { %p1880_p0 = por %p1879_p13, %p1878_p12 }
  0x22   :  { %p1881_p1 = pnand %p1880_p0, %p1874_p11 }
  0x24   :  { %1884 = shalt.err (!%p1881_p1)
}
  0x25   :  { %69 = dma.hbm_to_vmem [thread:$0]  %s2202_s5, 1024, %s64_s24, [#allocation9], %s1982_s19, %s1982_s19, %s1983_s20  }
  0x26   :  { %s1885_s17 = scalar_lea.hbm %s2197_s0, 256 }
  0x27   :  { %p1886_p2 = scmp.ne.s32.totalorder %s2197_s0, %s1885_s17  ;;  %p1889_p3 = scmp.lt.u32.totalorder %s1885_s17, %s2197_s0 }
  0x29   :  { %p1891_p4 = pnand %p1889_p3, %p1886_p2 }
  0x2b   :  { %1894 = shalt.err (!%p1891_p4)
}
  0x2c   :  { %s1895_s25 = scalar_lea.vmem %s24_s26, 256  ;;  %s1899_s27 = scalar_lea.vmem %s24_s26, 2048 }
  0x2d   :  { %p1896_p5 = scmp.ne.s32.totalorder %s24_s26, %s1895_s25  ;;  %p1900_p6 = scmp.lt.s32.totalorder %s24_s26, %s24_s26 }
  0x2e   :  { %p1901_p7 = scmp.lt.s32.totalorder %s1899_s27, %s1895_s25 }
  0x30   :  { %p1902_p8 = por %p1901_p7, %p1900_p6 }
  0x32   :  { %p1903_p9 = pnand %p1902_p8, %p1896_p5 }
  0x34   :  { %1906 = shalt.err (!%p1903_p9)
}
  0x35   :  { %s1986_s5 = smov 256   ;;  %s1987_s24 = smov 16  }
  0x36   :  { %29 = dma.hbm_to_vmem [thread:$0]  %s2197_s0, 256, %s24_s26, [#allocation3], %s1986_s5, %s1986_s5, %s1987_s24  }
  0x37   :  { %s1988_s30 = smov [#allocation7]   ;;  %s1989_s12 = smov [#allocation10]  }
  0x38   :  { %s49_s11 = sshll.u32 %s1988_s30, 4  ;;  %s77_s13 = sshll.u32 %s1989_s12, 4  ;;  %s50_s11 = int_to_ptr.vmem [resolvable:$true] %s49_s11  ;;  %s78_s13 = int_to_ptr.vmem [resolvable:$true] %s77_s13 }
  0x39   :  { %s1907_s14 = scalar_lea.hbm %s2200_s3, 1024 }
  0x3a   :  { %p1908_p10 = scmp.ne.s32.totalorder %s2200_s3, %s1907_s14  ;;  %p1911_p11 = scmp.lt.u32.totalorder %s1907_s14, %s2200_s3 }
  0x3c   :  { %p1913_p12 = pnand %p1911_p11, %p1908_p10 }
  0x3e   :  { %1916 = shalt.err (!%p1913_p12)
}
  0x3f   :  { %s1917_s0 = scalar_lea.vmem %s50_s11, 1024  ;;  %p1922_p0 = scmp.lt.s32.totalorder %s50_s11, %s50_s11 }
  0x40   :  { %p1918_p13 = scmp.ne.s32.totalorder %s50_s11, %s1917_s0  ;;  %p1923_p1 = scmp.lt.s32.totalorder %s1917_s0, %s1917_s0 }
  0x42   :  { %p1924_p2 = por %p1923_p1, %p1922_p0 }
  0x44   :  { %p1925_p3 = pnand %p1924_p2, %p1918_p13 }
  0x46   :  { %1928 = shalt.err (!%p1925_p3)
}
  0x47   :  { %55 = dma.hbm_to_vmem [thread:$0]  %s2200_s3, 1024, %s50_s11, [#allocation6], %s1982_s19, %s1982_s19, %s1983_s20  }
  0x48   :  { %s1929_s25 = scalar_lea.hbm %s2204_s7, 1024 }
  0x49   :  { %p1930_p4 = scmp.ne.s32.totalorder %s2204_s7, %s1929_s25  ;;  %p1933_p5 = scmp.lt.u32.totalorder %s1929_s25, %s2204_s7 }
  0x4b   :  { %p1935_p6 = pnand %p1933_p5, %p1930_p4 }
  0x4d   :  { %1938 = shalt.err (!%p1935_p6)
}
  0x4e   :  { %s1939_s30 = scalar_lea.vmem %s78_s13, 1024  ;;  %p1944_p8 = scmp.lt.s32.totalorder %s78_s13, %s78_s13 }
  0x4f   :  { %p1940_p7 = scmp.ne.s32.totalorder %s78_s13, %s1939_s30  ;;  %p1945_p9 = scmp.lt.s32.totalorder %s1939_s30, %s1939_s30 }
  0x51   :  { %p1946_p10 = por %p1945_p9, %p1944_p8 }
  0x53   :  { %p1947_p11 = pnand %p1946_p10, %p1940_p7 }
  0x55   :  { %1950 = shalt.err (!%p1947_p11)
}
  0x56   :  { %83 = dma.hbm_to_vmem [thread:$0]  %s2204_s7, 1024, %s78_s13, [#allocation9], %s1982_s19, %s1982_s19, %s1983_s20  }
  0x57   :  { %1973 = dma.done.wait [#allocation3], 2048  }
  0x58   :  { %1974 = vsyncadd [#allocation3], 4294965248 }
  0x59   :  { %1975 = dma.done.wait [#allocation6], 9216  }
  0x5a   :  { %1976 = vsyncadd [#allocation6], 4294958080 }
  0x5b   :  { %1977 = dma.done.wait [#allocation9], 2048  }
  0x5c   :  { %1978 = vsyncadd [#allocation9], 4294965248  ;;  %v1721_v0 = vld [vmem:[#allocation5 + $0x40] sm:$0xff]   ;;  %v1725_v4 = vld [vmem:[#allocation5 + $0x48] sm:$0xff]   ;;  %v1990_v25 = vmov 1983009808   ;;  %v141_v27 = vlaneseq }
  0x5d   :  { %v1722_v1 = vld [vmem:[#allocation5 + $0xc0] sm:$0xff]   ;;  %1531 = vmatprep.subr.bf16.mxu0 %v1721_v0  ;;  %v1726_v5 = vld [vmem:[#allocation5 + $0xc8] sm:$0xff]   ;;  %v1729_v8 = vld [vmem:[#allocation5 + $0x50] sm:$0xff]   ;;  %v139_v26 = vunpack.c.l.s4 %v1990_v25  ;;  %vm1992_vm0 = vmmov 0  }
  0x5e   :  { %v1723_v2 = vld [vmem:[#allocation5] sm:$0xff]   ;;  %1553 = vmatprep.subr.bf16.mxu1 %v1722_v1  ;;  %v1727_v6 = vld [vmem:[#allocation5 + $0x8] sm:$0xff]   ;;  %v1730_v9 = vld [vmem:[#allocation5 + $0xd0] sm:$0xff]   ;;  %v2119_v33 = vshrl.u32 %v141_v27, 7 }
  0x5f   :  { %v1724_v3 = vld [vmem:[#allocation5 + $0x80] sm:$0xff]   ;;  %1532 = vmatpush3.bf16.msra.mxu0 %v1723_v2  ;;  %v1728_v7 = vld [vmem:[#allocation5 + $0x88] sm:$0xff]   ;;  %v1731_v10 = vld [vmem:[#allocation5 + $0x10] sm:$0xff]   ;;  %v140_v32 = vunpack.c.0.s8 %v139_v26 }
  0x60   :  { %1554 = vmatpush3.bf16.msra.mxu1 %v1724_v3  ;;  %1533 = vmatprep.subr.bf16.mxu0 %v1725_v4  ;;  %v1732_v11 = vld [vmem:[#allocation5 + $0x90] sm:$0xff]   ;;  %v1733_v12 = vld [vmem:[#allocation5 + $0x58] sm:$0xff]   ;;  %v1737_v16 = vld [vmem:[#allocation5 + $0x60] sm:$0xff]  }
  0x61   :  { %1555 = vmatprep.subr.bf16.mxu1 %v1726_v5  ;;  %v1734_v13 = vld [vmem:[#allocation5 + $0xd8] sm:$0xff]   ;;  %v1738_v17 = vld [vmem:[#allocation5 + $0xe0] sm:$0xff]   ;;  %v1741_v20 = vld [vmem:[#allocation5 + $0x68] sm:$0xff]   ;;  %v2122_v37 = vsub.s32 %v140_v32, %v2119_v33 }
  0x62   :  { %v1735_v14 = vld [vmem:[#allocation5 + $0x18] sm:$0xff]   ;;  %v1739_v18 = vld [vmem:[#allocation5 + $0x20] sm:$0xff]   ;;  %v1742_v21 = vld [vmem:[#allocation5 + $0xe8] sm:$0xff]  }
  0x63   :  { %1534 = vmatpush3.bf16.msra.mxu0 %v1727_v6  ;;  %v1736_v15 = vld [vmem:[#allocation5 + $0x98] sm:$0xff]   ;;  %v1740_v19 = vld [vmem:[#allocation5 + $0xa0] sm:$0xff]   ;;  %v1743_v22 = vld [vmem:[#allocation5 + $0x28] sm:$0xff]  }
  0x64   :  { %1556 = vmatpush3.bf16.msra.mxu1 %v1728_v7  ;;  %1535 = vmatprep.subr.bf16.mxu0 %v1729_v8  ;;  %v1744_v23 = vld [vmem:[#allocation5 + $0xa8] sm:$0xff]   ;;  %v1745_v24 = vld [vmem:[#allocation5 + $0x70] sm:$0xff]   ;;  %v1749_v31 = vld [vmem:[#allocation5 + $0x78] sm:$0xff]  }
  0x65   :  { %1557 = vmatprep.subr.bf16.mxu1 %v1730_v9  ;;  %v1746_v28 = vld [vmem:[#allocation5 + $0xf0] sm:$0xff]   ;;  %v1750_v34 = vld [vmem:[#allocation5 + $0xf8] sm:$0xff]   ;;  %v1765_v53 = vld [vmem:[#allocation5 + $0x140] sm:$0xff]  }
  0x66   :  { %v1747_v29 = vld [vmem:[#allocation5 + $0x30] sm:$0xff]   ;;  %v1751_v35 = vld [vmem:[#allocation5 + $0x38] sm:$0xff]   ;;  %v1766_v58 = vld [vmem:[#allocation5 + $0x1c0] sm:$0xff]  }
  0x67   :  { %1536 = vmatpush3.bf16.msra.mxu0 %v1731_v10  ;;  %v1748_v30 = vld [vmem:[#allocation5 + $0xb0] sm:$0xff]   ;;  %v1752_v36 = vld [vmem:[#allocation5 + $0xb8] sm:$0xff]   ;;  %v1767_v62 = vld [vmem:[#allocation5 + $0x100] sm:$0xff]  }
  0x68   :  { %1558 = vmatpush3.bf16.msra.mxu1 %v1732_v11  ;;  %1537 = vmatprep.subr.bf16.mxu0 %v1733_v12  ;;  %v1753_v38 = vld [vmem:[#allocation2] ss:$16 sps:$4 sm:$0xff]   ;;  %v1761_v43 = vld [vmem:[#allocation2 + $0x4] ss:$16 sps:$4 sm:$0xff]   ;;  %v1769_v4 = vld [vmem:[#allocation5 + $0x148] sm:$0xff]  }
  0x69   :  { %1559 = vmatprep.subr.bf16.mxu1 %v1734_v13  ;;  %v1755_v39 = vld [vmem:[#allocation2 + $0x20] ss:$16 sps:$4 sm:$0xff]   ;;  %v144_v42 = vrot.slane %v1753_v38, %v2122_v37  ;;  %v1762_v44 = vld [vmem:[#allocation2 + $0x24] ss:$16 sps:$4 sm:$0xff]   ;;  %v151_v50 = vrot.slane %v1761_v43, %v2122_v37  ;;  %v1770_v7 = vld [vmem:[#allocation5 + $0x1c8] sm:$0xff]  }
  0x6a   :  { %v1757_v40 = vld [vmem:[#allocation2 + $0x40] ss:$16 sps:$4 sm:$0xff]   ;;  %v1763_v45 = vld [vmem:[#allocation2 + $0x44] ss:$16 sps:$4 sm:$0xff]   ;;  %v158_v46 = vrot.slane %v1755_v39, %v2122_v37  ;;  %v165_v51 = vrot.slane %v1762_v44, %v2122_v37  ;;  %v1771_v8 = vld [vmem:[#allocation5 + $0x108] sm:$0xff]  }
  0x6b   :  { %1538 = vmatpush3.bf16.msra.mxu0 %v1735_v14  ;;  %v1759_v41 = vld [vmem:[#allocation2 + $0x60] ss:$16 sps:$4 sm:$0xff]   ;;  %v216_v47 = vrot.slane %v1757_v40, %v2122_v37  ;;  %v1764_v49 = vld [vmem:[#allocation2 + $0x64] ss:$16 sps:$4 sm:$0xff]   ;;  %v223_v52 = vrot.slane %v1763_v45, %v2122_v37  ;;  %v1772_v9 = vld [vmem:[#allocation5 + $0x188] sm:$0xff]  }
  0x6c   :  { %1560 = vmatpush3.bf16.msra.mxu1 %v1736_v15  ;;  %1539 = vmatprep.subr.bf16.mxu0 %v1737_v16  ;;  %v230_v48 = vrot.slane %v1759_v41, %v2122_v37  ;;  %v167_v54 = vcombine.high %v144_v42, %v158_v46  ;;  %v237_v56 = vrot.slane %v1764_v49, %v2122_v37  ;;  %v1768_v2 = vld [vmem:[#allocation5 + $0x180] sm:$0xff]   ;;  %v1773_v10 = vld [vmem:[#allocation5 + $0x150] sm:$0xff]   ;;  %v1777_v14 = vld [vmem:[#allocation5 + $0x158] sm:$0xff]  }
  0x6d   :  { %1561 = vmatprep.subr.bf16.mxu1 %v1738_v17  ;;  %v166_v57 = vcombine.low %v144_v42, %v158_v46  ;;  %v169_v59 = vcombine.high %v151_v50, %v165_v51  ;;  %v168_v61 = vcombine.low %v151_v50, %v165_v51  ;;  %v1774_v11 = vld [vmem:[#allocation5 + $0x1d0] sm:$0xff]   ;;  %v1778_v15 = vld [vmem:[#allocation5 + $0x1d8] sm:$0xff]   ;;  %v1788_v25 = vld [vmem:[#allocation5 + $0x1a8] sm:$0xff]  }
  0x6e   :  { %v239_v55 = vcombine.high %v216_v47, %v230_v48  ;;  %v238_v60 = vcombine.low %v216_v47, %v230_v48  ;;  %v241_v0 = vcombine.high %v223_v52, %v237_v56  ;;  %v240_v1 = vcombine.low %v223_v52, %v237_v56  ;;  %v1775_v12 = vld [vmem:[#allocation5 + $0x110] sm:$0xff]   ;;  %v1779_v16 = vld [vmem:[#allocation5 + $0x118] sm:$0xff]  }
  0x6f   :  { %1540 = vmatpush3.bf16.msra.mxu0 %v1739_v18  ;;  %v1776_v13 = vld [vmem:[#allocation5 + $0x190] sm:$0xff]   ;;  %v1780_v17 = vld [vmem:[#allocation5 + $0x198] sm:$0xff]   ;;  %v1781_v18 = vld [vmem:[#allocation5 + $0x160] sm:$0xff]  }
  0x70   :  { %1562 = vmatpush3.bf16.msra.mxu1 %v1740_v19  ;;  %1541 = vmatprep.subr.bf16.mxu0 %v1741_v20  ;;  %v295_v63 = vpack.c.bf16 %v239_v55, %v167_v54  ;;  %v294_v3 = vpack.c.bf16 %v238_v60, %v166_v57  ;;  %v297_v5 = vpack.c.bf16 %v241_v0, %v169_v59  ;;  %v1782_v19 = vld [vmem:[#allocation5 + $0x1e0] sm:$0xff]   ;;  %v1789_v26 = vld [vmem:[#allocation5 + $0x170] sm:$0xff]   ;;  %v1795_v32 = vld [vmem:[#allocation5 + $0x138] sm:$0xff]  }
  0x71   :  { %1563 = vmatprep.subr.bf16.mxu1 %v1742_v21  ;;  %v296_v6 = vpack.c.bf16 %v240_v1, %v168_v61  ;;  %v1783_v20 = vld [vmem:[#allocation5 + $0x120] sm:$0xff]   ;;  %v1790_v27 = vld [vmem:[#allocation5 + $0x1f0] sm:$0xff]   ;;  %v1801_v38 = vld [vmem:[#allocation2 + $0x48] ss:$16 sps:$4 sm:$0xff]   ;;  %v1991_v1 = vmov 0.0  }
  0x72   :  { %853 = vmatprep.mubr.bf16.mxu0 %v295_v63  ;;  %894 = vmatprep.mubr.bf16.mxu1 %v297_v5  ;;  %v1784_v21 = vld [vmem:[#allocation5 + $0x1a0] sm:$0xff]   ;;  %v1803_v39 = vld [vmem:[#allocation2 + $0x68] ss:$16 sps:$4 sm:$0xff]   ;;  %v1805_v40 = vld [vmem:[#allocation2 + $0xc] ss:$16 sps:$4 sm:$0xff]   ;;  %v252_v44 = vrot.slane %v1801_v38, %v2122_v37 }
  0x73   :  { %1542 = vmatpush3.bf16.msra.mxu0 %v1743_v22  ;;  %v1785_v22 = vld [vmem:[#allocation5 + $0x168] sm:$0xff]   ;;  %v266_v47 = vrot.slane %v1803_v39, %v2122_v37  ;;  %v187_v48 = vrot.slane %v1805_v40, %v2122_v37  ;;  %v1809_v0 = vld [vmem:[#allocation7] sm:$0xff]  }
  0x74   :  { %1564 = vmatpush3.bf16.msra.mxu1 %v1744_v23  ;;  %1543 = vmatprep.subr.bf16.mxu0 %v1745_v24  ;;  %v1786_v23 = vld [vmem:[#allocation5 + $0x1e8] sm:$0xff]  }
  0x75   :  { %1565 = vmatprep.subr.bf16.mxu1 %v1746_v28  ;;  %v1787_v24 = vld [vmem:[#allocation5 + $0x128] sm:$0xff]   ;;  %v1791_v28 = vld [vmem:[#allocation5 + $0x130] sm:$0xff]   ;;  %v275_v54 = vcombine.high %v252_v44, %v266_v47  ;;  %v274_v56 = vcombine.low %v252_v44, %v266_v47 }
  0x76   :  { %v1806_v41 = vld [vmem:[#allocation2 + $0x2c] ss:$16 sps:$4 sm:$0xff]  }
  0x77   :  { %1544 = vmatpush3.bf16.msra.mxu0 %v1747_v29  ;;  %v1792_v29 = vld [vmem:[#allocation5 + $0x1b0] sm:$0xff]   ;;  %v1807_v45 = vld [vmem:[#allocation2 + $0x4c] ss:$16 sps:$4 sm:$0xff]   ;;  %v201_v49 = vrot.slane %v1806_v41, %v2122_v37 }
  0x78   :  { %1566 = vmatpush3.bf16.msra.mxu1 %v1748_v30  ;;  %1545 = vmatprep.subr.bf16.mxu0 %v1749_v31  ;;  %v1793_v30 = vld [vmem:[#allocation5 + $0x178] sm:$0xff]   ;;  %v259_v51 = vrot.slane %v1807_v45, %v2122_v37  ;;  %v1814_v5 = vld [vmem:[#allocation7 + $0x28] sm:$0xff]  }
  0x79   :  { %1567 = vmatprep.subr.bf16.mxu1 %v1750_v34  ;;  %v1794_v31 = vld [vmem:[#allocation5 + $0x1f8] sm:$0xff]   ;;  %v205_v55 = vcombine.high %v187_v48, %v201_v49  ;;  %v204_v57 = vcombine.low %v187_v48, %v201_v49 }
  0x7a   :  { %v1796_v34 = vld [vmem:[#allocation5 + $0x1b8] sm:$0xff]  }
  0x7b   :  { %1546 = vmatpush3.bf16.msra.mxu0 %v1751_v35  ;;  %v1797_v35 = vld [vmem:[#allocation2 + $0x8] ss:$16 sps:$4 sm:$0xff]   ;;  %v1808_v46 = vld [vmem:[#allocation2 + $0x6c] ss:$16 sps:$4 sm:$0xff]  }
  0x7c   :  { %1568 = vmatpush3.bf16.msra.mxu1 %v1752_v36  ;;  %1575 = vmatprep.subr.bf16.mxu0 %v1765_v53  ;;  %v1799_v36 = vld [vmem:[#allocation2 + $0x28] ss:$16 sps:$4 sm:$0xff]   ;;  %v180_v42 = vrot.slane %v1797_v35, %v2122_v37  ;;  %v273_v52 = vrot.slane %v1808_v46, %v2122_v37 }
  0x7d   :  { %1597 = vmatprep.subr.bf16.mxu1 %v1766_v58  ;;  %v194_v43 = vrot.slane %v1799_v36, %v2122_v37  ;;  %v1810_v37 = vld [vmem:[#allocation7 + $0x8] sm:$0xff]  }
  0x7e   :  { %854 = vmatmul.mubr.bf16.vlgmr.msra.gmra.mrb[0].mxu0 %v294_v3  ;;  %v277_v58 = vcombine.high %v259_v51, %v273_v52  ;;  %v276_v59 = vcombine.low %v259_v51, %v273_v52  ;;  %v1812_v3 = vld [vmem:[#allocation7 + $0x18] sm:$0xff]   ;;  %v1499_v52 = vld [vmem:[%s2201_s4] ss:$0 sm:$0xff] }
  0x7f   :  { %1576 = vmatpush3.bf16.msra.mxu0 %v1767_v62  ;;  %895 = vmatmul.mubr.bf16.vlgmr.msra.gmra.mrb[0].mxu1 %v296_v6  ;;  %v203_v50 = vcombine.high %v180_v42, %v194_v43  ;;  %v202_v53 = vcombine.low %v180_v42, %v194_v43  ;;  %v1815_v6 = vld [vmem:[#allocation7 + $0x30] sm:$0xff]   ;;  %v1824_v51 = vld [vmem:[#allocation8 + $0x38] sm:$0xff]  }
  0x80   :  { %1577 = vmatprep.subr.bf16.mxu0 %v1769_v4  ;;  %1598 = vmatpush3.bf16.msra.mxu1 %v1768_v2  ;;  %v301_v62 = vpack.c.bf16 %v277_v58, %v205_v55  ;;  %v300_v63 = vpack.c.bf16 %v276_v59, %v204_v57  ;;  %v1811_v2 = vld [vmem:[#allocation7 + $0x10] sm:$0xff]   ;;  %v1813_v4 = vld [vmem:[#allocation7 + $0x20] sm:$0xff]  }
  0x81   :  { %1599 = vmatprep.subr.bf16.mxu1 %v1770_v7  ;;  %v299_v60 = vpack.c.bf16 %v275_v54, %v203_v50  ;;  %v298_v61 = vpack.c.bf16 %v274_v56, %v202_v53  ;;  %v1816_v7 = vld [vmem:[#allocation7 + $0x38] sm:$0xff]   ;;  %v1823_v50 = vld [vmem:[#allocation8 + $0x30] sm:$0xff]  }
  0x82   :  { %976 = vmatprep.mubr.bf16.mxu1 %v301_v62 }
  0x83   :  { %1578 = vmatpush3.bf16.msra.mxu0 %v1771_v8  ;;  %935 = vmatprep.mubr.bf16.mxu0 %v299_v60  ;;  %v1817_v8 = vld [vmem:[#allocation8] sm:$0xff]  }
  0x84   :  { %1579 = vmatprep.subr.bf16.mxu0 %v1773_v10  ;;  %1600 = vmatpush3.bf16.msra.mxu1 %v1772_v9  ;;  %v1818_v9 = vld [vmem:[#allocation8 + $0x8] sm:$0xff]   ;;  %v1819_v10 = vld [vmem:[#allocation8 + $0x10] sm:$0xff]  }
  0x85   :  { %1601 = vmatprep.subr.bf16.mxu1 %v1774_v11  ;;  %v1820_v11 = vld [vmem:[#allocation8 + $0x18] sm:$0xff]  }
  0x87   :  { %1580 = vmatpush3.bf16.msra.mxu0 %v1775_v12  ;;  %v1821_v12 = vld [vmem:[#allocation8 + $0x20] sm:$0xff]  }
  0x88   :  { %1581 = vmatprep.subr.bf16.mxu0 %v1777_v14  ;;  %1602 = vmatpush3.bf16.msra.mxu1 %v1776_v13  ;;  %v1822_v13 = vld [vmem:[#allocation8 + $0x28] sm:$0xff]  }
  0x89   :  { %1603 = vmatprep.subr.bf16.mxu1 %v1778_v15  ;;  %v1434_v15 = vld [vmem:[%s2199_s2] ss:$0 sm:$0xff] }
  0x8b   :  { %1582 = vmatpush3.bf16.msra.mxu0 %v1779_v16 }
  0x8c   :  { %1583 = vmatprep.subr.bf16.mxu0 %v1781_v18  ;;  %1604 = vmatpush3.bf16.msra.mxu1 %v1780_v17 }
  0x8d   :  { %1605 = vmatprep.subr.bf16.mxu1 %v1782_v19 }
  0x8f   :  { %1584 = vmatpush3.bf16.msra.mxu0 %v1783_v20 }
  0x90   :  { %1585 = vmatprep.subr.bf16.mxu0 %v1785_v22  ;;  %1606 = vmatpush3.bf16.msra.mxu1 %v1784_v21 }
  0x91   :  { %1607 = vmatprep.subr.bf16.mxu1 %v1786_v23 }
  0x93   :  { %1586 = vmatpush3.bf16.msra.mxu0 %v1787_v24 }
  0x94   :  { %1587 = vmatprep.subr.bf16.mxu0 %v1789_v26  ;;  %1608 = vmatpush3.bf16.msra.mxu1 %v1788_v25 }
  0x95   :  { %1609 = vmatprep.subr.bf16.mxu1 %v1790_v27 }
  0x97   :  { %1588 = vmatpush3.bf16.msra.mxu0 %v1791_v28 }
  0x98   :  { %1589 = vmatprep.subr.bf16.mxu0 %v1793_v30  ;;  %1610 = vmatpush3.bf16.msra.mxu1 %v1792_v29 }
  0x99   :  { %1611 = vmatprep.subr.bf16.mxu1 %v1794_v31 }
  0x9b   :  { %1590 = vmatpush3.bf16.msra.mxu0 %v1795_v32 }
  0x9c   :  { %1612 = vmatpush3.bf16.msra.mxu1 %v1796_v34  ;;  %1646 = vmatprep.subr.bf16.mxu0 %v1991_v1 }
  0x9d   :  { %1666 = vmatprep.subr.bf16.mxu1 %v1991_v1 }
  0x9e   :  { %936 = vmatmul.mubr.bf16.vlgmr.msra.gmra.mrb[4].mxu0 %v298_v61 }
  0x9f   :  { %977 = vmatmul.mubr.bf16.vlgmr.msra.gmra.mrb[4].mxu1 %v300_v63  ;;  %1647 = vmatpush3.bf16.msra.mxu0 %v1809_v0  ;;  %v1508_v0 = vld [vmem:[%s2203_s6] ss:$0 sm:$0xff] }
  0xa0   :  { %1648 = vmatprep.subr.bf16.mxu0 %v1991_v1  ;;  %1662 = vmatprep.mubr.msk.bf16.mxu0 %vm1992_vm0, %v1991_v1 }
  0xa1   :  { %1682 = vmatprep.mubr.msk.bf16.mxu1 %vm1992_vm0, %v1991_v1  ;;  %1667 = vmatpush3.bf16.msra.mxu1 %v1817_v8  ;;  %v1826_v8 = vld [vmem:[#allocation10 + $0x8] sm:$0xff]  }
  0xa2   :  { %1668 = vmatprep.subr.bf16.mxu1 %v1991_v1 }
  0xa3   :  { %1649 = vmatpush3.bf16.msra.mxu0 %v1810_v37 }
  0xa4   :  { %1650 = vmatprep.subr.bf16.mxu0 %v1991_v1 }
  0xa5   :  { %1669 = vmatpush3.bf16.msra.mxu1 %v1818_v9  ;;  %v1827_v9 = vld [vmem:[#allocation10 + $0x10] sm:$0xff]  }
  0xa6   :  { %1670 = vmatprep.subr.bf16.mxu1 %v1991_v1 }
  0xa7   :  { %1651 = vmatpush3.bf16.msra.mxu0 %v1811_v2 }
  0xa8   :  { %1652 = vmatprep.subr.bf16.mxu0 %v1991_v1 }
  0xa9   :  { %1671 = vmatpush3.bf16.msra.mxu1 %v1819_v10 }
  0xaa   :  { %1672 = vmatprep.subr.bf16.mxu1 %v1991_v1 }
  0xab   :  { %1653 = vmatpush3.bf16.msra.mxu0 %v1812_v3 }
  0xac   :  { %1654 = vmatprep.subr.bf16.mxu0 %v1991_v1 }
  0xad   :  { %1673 = vmatpush3.bf16.msra.mxu1 %v1820_v11 }
  0xae   :  { %1674 = vmatprep.subr.bf16.mxu1 %v1991_v1 }
  0xaf   :  { %1655 = vmatpush3.bf16.msra.mxu0 %v1813_v4 }
  0xb0   :  { %1656 = vmatprep.subr.bf16.mxu0 %v1991_v1 }
  0xb1   :  { %1675 = vmatpush3.bf16.msra.mxu1 %v1821_v12 }
  0xb2   :  { %1676 = vmatprep.subr.bf16.mxu1 %v1991_v1 }
  0xb3   :  { %1657 = vmatpush3.bf16.msra.mxu0 %v1814_v5 }
  0xb4   :  { %1658 = vmatprep.subr.bf16.mxu0 %v1991_v1 }
  0xb5   :  { %1677 = vmatpush3.bf16.msra.mxu1 %v1822_v13 }
  0xb6   :  { %1678 = vmatprep.subr.bf16.mxu1 %v1991_v1 }
  0xb7   :  { %1659 = vmatpush3.bf16.msra.mxu0 %v1815_v6 }
  0xb8   :  { %1660 = vmatprep.subr.bf16.mxu0 %v1991_v1 }
  0xb9   :  { %1679 = vmatpush3.bf16.msra.mxu1 %v1823_v50 }
  0xba   :  { %1680 = vmatprep.subr.bf16.mxu1 %v1991_v1 }
  0xbb   :  { %1661 = vmatpush3.bf16.msra.mxu0 %v1816_v7  ;;  %v1825_v7 = vld [vmem:[#allocation10] sm:$0xff]  }
  0xbc   :  { %1686 = vmatprep.subr.bf16.mxu0 %v1991_v1 }
  0xbd   :  { %1681 = vmatpush3.bf16.msra.mxu1 %v1824_v51 }
 0x151   :  { %v1547_v14 = vpop.f32.mrb[0].mxu0 }
 0x152   :  { %v1548_v16 = vpop.f32.mrb[1].mxu0  ;;  %v1569_v17 = vpop.f32.mrb[0].mxu1 }
 0x153   :  { %v1549_v18 = vadd.f32 %v1548_v16, %v1547_v14  ;;  %v1550_v19 = vpop.f32.mrb[2].mxu0  ;;  %v1570_v20 = vpop.f32.mrb[1].mxu1 }
 0x154   :  { %v1551_v21 = vpop.f32.mrb[3].mxu0  ;;  %v1571_v23 = vadd.f32 %v1570_v20, %v1569_v17  ;;  %v1572_v24 = vpop.f32.mrb[2].mxu1  ;;  %v1830_v20 = vld [vmem:[#allocation10 + $0x28] sm:$0xff]  }
 0x155   :  { %v856_v22 = vadd.f32 %v1549_v18, %v1434_v15  ;;  %v1552_v25 = vadd.f32 %v1551_v21, %v1550_v19  ;;  %v1573_v26 = vpop.f32.mrb[3].mxu1  ;;  %v1828_v18 = vld [vmem:[#allocation10 + $0x18] sm:$0xff]   ;;  %v1829_v19 = vld [vmem:[#allocation10 + $0x20] sm:$0xff]   ;;  %v1831_v21 = vld [vmem:[#allocation10 + $0x30] sm:$0xff]  }
 0x156   :  { %v1574_v29 = vadd.f32 %v1573_v26, %v1572_v24 }
 0x157   :  { %v897_v27 = vadd.f32 %v1571_v23, %v856_v22  ;;  %v859_v28 = vadd.f32 %v1552_v25, %v1434_v15  ;;  %v1832_v22 = vld [vmem:[#allocation10 + $0x38] sm:$0xff]  }
 0x159   :  { %v900_v30 = vadd.f32 %v1574_v29, %v859_v28 }
 0x171   :  { %v1591_v31 = vpop.f32.mrb[4].mxu0 }
 0x172   :  { %v1613_v32 = vpop.f32.mrb[4].mxu1  ;;  %v1592_v34 = vpop.f32.mrb[5].mxu0 }
 0x173   :  { %v1593_v35 = vadd.f32 %v1592_v34, %v1591_v31  ;;  %v1614_v36 = vpop.f32.mrb[5].mxu1  ;;  %v1594_v38 = vpop.f32.mrb[6].mxu0  ;;  %v1517_v34 = vld [vmem:[%s2205_s8] ss:$0 sm:$0xff] }
 0x174   :  { %v1615_v39 = vadd.f32 %v1614_v36, %v1613_v32  ;;  %v1616_v40 = vpop.f32.mrb[6].mxu1  ;;  %v1595_v41 = vpop.f32.mrb[7].mxu0 }
 0x175   :  { %v938_v42 = vadd.f32 %v1593_v35, %v897_v27  ;;  %v1596_v43 = vadd.f32 %v1595_v41, %v1594_v38  ;;  %v1617_v44 = vpop.f32.mrb[7].mxu1 }
 0x176   :  { %v1618_v45 = vadd.f32 %v1617_v44, %v1616_v40 }
 0x177   :  { %v979_v46 = vadd.f32 %v1615_v39, %v938_v42  ;;  %v941_v47 = vadd.f32 %v1596_v43, %v900_v30  ;;  %v1993_v30 = vmov 1966171168  }
 0x178   :  { %v1352_v31 = vunpack.c.l.s4 %v1993_v30 }
 0x179   :  { %v982_v48 = vadd.f32 %v1618_v45, %v941_v47 }
 0x17a   :  { %v1353_v32 = vunpack.c.0.s8 %v1352_v31 }
 0x17b   :  { %v985_v49 = vpack.c.bf16 %v982_v48, %v979_v46 }
 0x17c   :  { %v1356_v40 = vsub.s32 %v1353_v32, %v2119_v33 }
 0x17d   :  { %1663 = vmatmul.mubr.bf16.vlgmr.msra.gmra.mrb[8].mxu0 %v985_v49 }
 0x17e   :  { %1702 = vmatprep.mubr.msk.bf16.mxu0 %vm1992_vm0, %v1991_v1  ;;  %1687 = vmatpush3.bf16.msra.mxu0 %v1825_v7 }
 0x17f   :  { %1688 = vmatprep.subr.bf16.mxu0 %v1991_v1 }
 0x182   :  { %1689 = vmatpush3.bf16.msra.mxu0 %v1826_v8 }
 0x183   :  { %1690 = vmatprep.subr.bf16.mxu0 %v1991_v1 }
 0x186   :  { %1691 = vmatpush3.bf16.msra.mxu0 %v1827_v9 }
 0x187   :  { %1692 = vmatprep.subr.bf16.mxu0 %v1991_v1 }
 0x18a   :  { %1693 = vmatpush3.bf16.msra.mxu0 %v1828_v18 }
 0x18b   :  { %1694 = vmatprep.subr.bf16.mxu0 %v1991_v1 }
 0x18e   :  { %1695 = vmatpush3.bf16.msra.mxu0 %v1829_v19 }
 0x18f   :  { %1696 = vmatprep.subr.bf16.mxu0 %v1991_v1 }
 0x192   :  { %1697 = vmatpush3.bf16.msra.mxu0 %v1830_v20 }
 0x193   :  { %1698 = vmatprep.subr.bf16.mxu0 %v1991_v1 }
 0x196   :  { %1699 = vmatpush3.bf16.msra.mxu0 %v1831_v21 }
 0x197   :  { %1700 = vmatprep.subr.bf16.mxu0 %v1991_v1 }
 0x19a   :  { %1701 = vmatpush3.bf16.msra.mxu0 %v1832_v22 }
 0x250   :  { %v1091_v53 = vpop.f32.mrb[8].mxu0 }
 0x251   :  { %v1092_v54 = vadd.f32 %v1499_v52, %v1091_v53  ;;  %v1664_v55 = vpop.f32.mrb[9].mxu0 }
 0x252   :  { %v1094_v56 = vpop.f32.mrb[10].mxu0 }
 0x253   :  { %v1100_v57 = vmul.f32 0.01, %v1092_v54  ;;  %v1095_v58 = vadd.f32 %v1499_v52, %v1094_v56  ;;  %v1665_v59 = vpop.f32.mrb[11].mxu0  ;;  %vm1098_vm1 = vcmp.ge.f32.partialorder %v1092_v54, 0.0 }
 0x255   :  { %vm1099_vm2 = vcmp.ge.f32.partialorder %v1095_v58, 0.0  ;;  %v1101_v60 = vmul.f32 0.01, %v1095_v58  ;;  %v1102_v61 = vsel %vm1098_vm1, %v1092_v54, %v1100_v57 }
 0x257   :  { %v1103_v62 = vsel %vm1099_vm2, %v1095_v58, %v1101_v60 }
 0x258   :  { %v1104_v63 = vpack.c.bf16 %v1103_v62, %v1102_v61 }
 0x25a   :  { %1683 = vmatmul.mubr.bf16.vlgmr.msra.gmra.mrb[8].mxu1 %v1104_v63 }
 0x32d   :  { %v1210_v37 = vpop.f32.mrb[8].mxu1 }
 0x32e   :  { %v1211_v2 = vadd.f32 %v1508_v0, %v1210_v37  ;;  %v1684_v3 = vpop.f32.mrb[9].mxu1 }
 0x32f   :  { %v1213_v4 = vpop.f32.mrb[10].mxu1 }
 0x330   :  { %1217 = vmax.xlane.f32.xlu0 %v1211_v2  ;;  %v1685_v5 = vpop.f32.mrb[11].mxu1  ;;  %v1214_v6 = vadd.f32 %v1508_v0, %v1213_v4 }
 0x334   :  { %1219 = vmax.xlane.f32.xlu0 %v1214_v6 }
 0x3bd   :  { %v1218_v10 = vpop.xlane.xlu0 %1217 }
 0x3be   :  { %v1221_v11 = vsub.f32 %v1211_v2, %v1218_v10 }
 0x3c0   :  { %v1223_v12 = vmul.f32 1.442695, %v1221_v11 }
 0x3c1   :  { %v1220_v13 = vpop.xlane.xlu0 %1219 }
 0x3c2   :  { %1833 = vpow2.f32 %v1223_v12  ;;  %v1222_v14 = vsub.f32 %v1214_v6, %v1220_v13 }
 0x3c4   :  { %v1225_v15 = vmul.f32 1.442695, %v1222_v14 }
 0x3c6   :  { %1835 = vpow2.f32 %v1225_v15 }
 0x3cc   :  { %v1834_v16 = vpop.eup %1833 }
 0x3cd   :  { %1227 = vadd.xlane.f32.xlu1 %v1834_v16 }
 0x3d0   :  { %v1836_v17 = vpop.eup %1835 }
 0x3d1   :  { %1229 = vadd.xlane.f32.xlu1 %v1836_v17 }
 0x45a   :  { %v1228_v23 = vpop.xlane.xlu1 %1227 }
 0x45b   :  { %1837 = vrcp.f32 %v1228_v23 }
 0x45e   :  { %v1230_v24 = vpop.xlane.xlu1 %1229 }
 0x45f   :  { %1839 = vrcp.f32 %v1230_v24 }
 0x465   :  { %v1838_v25 = vpop.eup %1837 }
 0x466   :  { %v1233_v27 = vmul.f32 %v1838_v25, %v1834_v16 }
 0x469   :  { %v1840_v26 = vpop.eup %1839 }
 0x46a   :  { %v1234_v28 = vmul.f32 %v1840_v26, %v1836_v17 }
 0x46c   :  { %v1235_v29 = vpack.c.bf16 %v1234_v28, %v1233_v27 }
 0x46e   :  { %1703 = vmatmul.mubr.bf16.vlgmr.msra.gmra.mrb[12].mxu0 %v1235_v29 }
 0x541   :  { %v1341_v35 = vpop.f32.mrb[12].mxu0 }
 0x542   :  { %v1704_v1 = vpop.f32.mrb[13].mxu0  ;;  %v1342_v38 = vadd.f32 %v1517_v34, %v1341_v35 }
 0x543   :  { %v1344_v36 = vpop.f32.mrb[14].mxu0 }
 0x544   :  { %v1345_v39 = vadd.f32 %v1517_v34, %v1344_v36  ;;  %v1705_v41 = vpop.f32.mrb[15].mxu0 }
 0x546   :  { %v1348_v42 = vpack.c.bf16 %v1345_v39, %v1342_v38  ;;  %v1526_v43 = vpack.c.bf16 %v1345_v39, %v1345_v39 }
 0x548   :  { %v1357_v44 = vrot.slane %v1348_v42, %v1356_v40  ;;  %v1364_v45 = vrot.slane %v1526_v43, %v1356_v40 }
 0x54a   :  { %v1365_v46 = vcombine.high %v1357_v44, %v1357_v44  ;;  %v1366_v47 = vcombine.high %v1364_v45, %v1364_v45  ;;  %v1373_v48 = vrot.slane %v1357_v44, %v1356_v40  ;;  %v1380_v49 = vrot.slane %v1364_v45, %v1356_v40  ;;  %1527 = vst.sshfl [vmem:[#allocation11] sm:$0x1 pattern:$0x73625140] %v1357_v44 }
 0x54b   :  { %1529 = vst.sshfl [vmem:[#allocation11 + $0x4] sm:$0x1 pattern:$0x73625140] %v1364_v45 }
 0x54c   :  { %v1387_v50 = vrot.slane %v1365_v46, %v1356_v40  ;;  %v1394_v51 = vrot.slane %v1366_v47, %v1356_v40  ;;  %v1395_v52 = vcombine.high %v1373_v48, %v1373_v48  ;;  %v1396_v53 = vcombine.high %v1380_v49, %v1380_v49  ;;  %1528 = vst.sshfl [vmem:[#allocation11 + $0x1] sm:$0x1 pattern:$0x73625140] %v1365_v46 }
 0x54d   :  { %1530 = vst.sshfl [vmem:[#allocation11 + $0x5] sm:$0x1 pattern:$0x73625140] %v1366_v47 }
 0x54e   :  { %v1397_v54 = vcombine.high %v1387_v50, %v1387_v50  ;;  %v1398_v55 = vcombine.high %v1394_v51, %v1394_v51  ;;  %1409 = vst [vmem:[#allocation11 + $0x2] sm:$0x1] %v1395_v52  ;;  %1413 = vst [vmem:[#allocation11 + $0x6] sm:$0x1] %v1396_v53 }
 0x550   :  { %1410 = vst [vmem:[#allocation11 + $0x3] sm:$0x1] %v1397_v54  ;;  %1414 = vst [vmem:[#allocation11 + $0x7] sm:$0x1] %v1398_v55 }
 0x551   :  { %1419 = vsyncadd [#allocation4], 112  ;;  %s1994_s8 = smov [#allocation11]  }
 0x552   :  { %s1420_s1 = sshll.u32 %s1994_s8, 4  ;;  %s1421_s1 = int_to_ptr.vmem [resolvable:$true] %s1420_s1 }
 0x553   :  { %s1951_s10 = scalar_lea.vmem %s1421_s1, 16  ;;  %s1955_s14 = scalar_lea.vmem %s1421_s1, 128 }
 0x554   :  { %p1952_p12 = scmp.ne.s32.totalorder %s1421_s1, %s1951_s10  ;;  %p1956_p13 = scmp.lt.s32.totalorder %s1421_s1, %s1421_s1 }
 0x555   :  { %p1957_p0 = scmp.lt.s32.totalorder %s1955_s14, %s1951_s10 }
 0x557   :  { %p1958_p1 = por %p1957_p0, %p1956_p13 }
 0x559   :  { %p1959_p2 = pnand %p1958_p1, %p1952_p12 }
 0x55b   :  { %1962 = shalt.err (!%p1959_p2)
}
 0x55c   :  { %s1963_s17 = scalar_lea.hbm %s2206_s9, 16 }
 0x55d   :  { %p1964_p3 = scmp.ne.s32.totalorder %s2206_s9, %s1963_s17  ;;  %p1967_p4 = scmp.lt.u32.totalorder %s1963_s17, %s2206_s9 }
 0x55f   :  { %p1969_p5 = pnand %p1967_p4, %p1964_p3 }
 0x561   :  { %1972 = shalt.err (!%p1969_p5)
}
 0x562   :  { %s1995_s22 = smov 1  }
 0x563   :  { %1426 = dma.vmem_to_hbm [thread:$0]  %s1421_s1, 16, %s2206_s9, [#allocation4], %s1987_s24, %s1987_s24, %s1995_s22  }
 0x564   :  { %1979 = dma.done.wait [#allocation4], 128  }
 0x565   :  { %1980 = vsyncadd [#allocation4], 4294967168 }
 0x566   :  { %1430 = vsyncpa [#allocation3], 1 }
 0x567   :  { %1431 = vsyncpa [#allocation6], 1 }
 0x568   :  { %1432 = vsyncpa [#allocation9], 1 }
 0x569   :  { %1433 = vsyncpa [#allocation4], 1 }

</bundles_post_ra>
